<compile_context>
chip_gen: v5e
topology: v5e:2x2
jax: 0.10.0
libtpu: 0.0.40
codegen_flags: <defaults>
</compile_context>

<pallas_src>
import functools

import jax
import jax.numpy as jnp
from jax.experimental import pallas as pl
from jax.experimental.pallas import tpu as pltpu

LANE = 128  # matmul lane width; channels are padded to this *inside* the kernel


def _round_up(x, m):
    return (x + m - 1) // m * m


# ----------------------------------------------------------------------------
# Kernel: one (batch, time-tile) cell.  Time tiles run sequentially per batch
# and carry their causal history in VMEM scratch.
# ----------------------------------------------------------------------------
def temporal_block_kernel(
    x_ref,                      # (1, TT, Cin)  bf16   current time tile (channels-last)
    w1_ref, b1_ref,             # (K*CP, CP) bf16 , (1, CP) f32
    w2_ref, b2_ref,             # (K*CP, CP) bf16 , (1, CP) f32
    wd_ref, bd_ref,             # (CP, CP)  bf16 , (1, CP) f32   (1x1 downsample)
    out_ref,                    # (1, TT, Cout)  f32
    xbuf_ref,                   # (hpad+TT, CP) f32 scratch: x window (+ carried history)
    h1buf_ref,                  # (hpad+TT, CP) f32 scratch: conv1 out (+ carried history)
    *, K, dilation, hpad, tile_t, cin, cout, has_downsample,
):
    f32 = jnp.float32
    bf16 = jnp.bfloat16
    TT = tile_t
    CP = LANE
    t = pl.program_id(1)

    # ---- history management -------------------------------------------------
    # t == 0: zero both window buffers.  The zeroed leading `hpad` rows are
    # exactly PyTorch's zero left-padding for conv1 (x history) and conv2
    # (conv1-output history).  Pad lanes [cin:CP] are zeroed here once and are
    # never written afterwards, so they stay zero for every tile.
    @pl.when(t == 0)
    def _():
        xbuf_ref[...] = jnp.zeros_like(xbuf_ref)
        h1buf_ref[...] = jnp.zeros_like(h1buf_ref)

    # t > 0: carry the last `hpad` rows of the previous tile's window forward.
    @pl.when(t > 0)
    def _():
        xbuf_ref[0:hpad, :] = xbuf_ref[TT:TT + hpad, :]
        h1buf_ref[0:hpad, :] = h1buf_ref[TT:TT + hpad, :]

    # ---- stage the current x tile into the lane-padded window buffer --------
    xbuf_ref[hpad:hpad + TT, 0:cin] = x_ref[0].astype(f32)

    def causal_conv(buf_ref, w_ref, b_ref):
        # Per-tap accumulation: K (TT, CP) x (CP, CP) MXU dots, f32 accumulate.
        # Output local row i reads buffer row  hpad + i - dilation*(K-1-j).
        acc = None
        for j in range(K):
            off = hpad - dilation * (K - 1 - j)          # static, >= 0
            tap = buf_ref[off:off + TT, :].astype(bf16)  # (TT, CP)
            part = jnp.dot(tap, w_ref[j * CP:(j + 1) * CP, :],
                           preferred_element_type=f32)
            acc = part if acc is None else acc + part
        return acc + b_ref[...]                          # broadcast (1, CP)

    # ---- conv1 -> chomp -> relu (dropout1 = identity) ------------------------
    h1 = jnp.maximum(causal_conv(xbuf_ref, w1_ref, b1_ref), 0.0)   # (TT, CP) f32
    h1buf_ref[hpad:hpad + TT, :] = h1

    # ---- conv2 -> chomp -> relu (dropout2 = identity) ------------------------
    h2 = jnp.maximum(causal_conv(h1buf_ref, w2_ref, b2_ref), 0.0)  # (TT, CP) f32

    # ---- residual ------------------------------------------------------------
    if has_downsample:
        res = jnp.dot(xbuf_ref[hpad:hpad + TT, :].astype(bf16), wd_ref[...],
                      preferred_element_type=f32) + bd_ref[...]
    else:
        # in_channels == out_channels: add the skip connection directly in f32
        # (no eye-matrix matmul, no extra bf16 rounding of the residual path).
        res = xbuf_ref[hpad:hpad + TT, :]

    out = jnp.maximum(h2 + res, 0.0)
    out_ref[0] = out[:, 0:cout].astype(out_ref.dtype)


# ----------------------------------------------------------------------------
# Channels-last core wrapper: (B, T, Cin) bf16 -> (B, T, Cout) f32.
# For stacked TemporalBlocks, chain this directly to avoid per-block NCL
# transposes (one conversion at the model boundary only).
# ----------------------------------------------------------------------------
def temporal_block_btc(x_btc, params, *, kernel_size, dilation, tile_t=256):
    B, T, Cin = x_btc.shape
    K = kernel_size
    Cout = params["conv1_w"].shape[0]
    CP = LANE
    assert Cin <= CP and Cout <= CP, "channel dims above 128 not handled here"

    # History rows carried between tiles; multiple of 8 so buffer-slice store
    # boundaries are sublane-aligned.
    hpad = _round_up(max(dilation * (K - 1), 1), 8)

    # Time tile: big by default (amortize per-step overhead, fill MXU rows),
    # multiple of 16 (bf16 sublane packing), at least `hpad`.
    TT = _round_up(min(tile_t, _round_up(T, 16)), 16)
    TT = max(TT, hpad)
    n_tiles = pl.cdiv(T, TT)
    T_pad = n_tiles * TT

    # ---- weights: per-tap layout, channel-padded to 128, bf16 ----------------
    def pack_conv(w):                       # w: (cout, cin, K) -> (K*CP, CP)
        co, ci, kk = w.shape
        flat = jnp.zeros((kk * CP, CP), jnp.float32)
        for j in range(kk):
            flat = flat.at[j * CP:j * CP + ci, :co].set(w[:, :, j].T)
        return flat.astype(jnp.bfloat16)

    def pack_bias(b):
        return jnp.zeros((1, CP), jnp.float32).at[0, :b.shape[0]].set(b)

    w1 = pack_conv(params["conv1_w"])
    b1 = pack_bias(params["conv1_b"])
    w2 = pack_conv(params["conv2_w"])
    b2 = pack_bias(params["conv2_b"])

    has_down = params.get("down_w") is not None
    if has_down:
        wd = jnp.zeros((CP, CP), jnp.float32).at[:Cin, :Cout].set(
            params["down_w"][:, :, 0].T).astype(jnp.bfloat16)
        bd = pack_bias(params["down_b"])
    else:
        wd = jnp.zeros((CP, CP), jnp.bfloat16)   # unused (static branch in kernel)
        bd = jnp.zeros((1, CP), jnp.float32)

    # ---- input: bf16, channels UNPADDED, time padded to the tile grid --------
    x_btc = x_btc.astype(jnp.bfloat16)
    if T_pad != T:
        x_btc = jnp.pad(x_btc, ((0, 0), (0, T_pad - T), (0, 0)))

    kernel = functools.partial(
        temporal_block_kernel, K=K, dilation=dilation, hpad=hpad, tile_t=TT,
        cin=Cin, cout=Cout, has_downsample=has_down)

    matmuls_per_tile = 2 * K + (1 if has_down else 0)
    flops = int(2 * B * n_tiles * TT * CP * CP * matmuls_per_tile)
    bytes_accessed = int(x_btc.size * 2
                         + (w1.size + w2.size + wd.size) * 2
                         + (b1.size + b2.size + bd.size) * 4
                         + B * T_pad * Cout * 4)

    out = pl.pallas_call(
        kernel,
        out_shape=jax.ShapeDtypeStruct((B, T_pad, Cout), jnp.float32),
        grid=(B, n_tiles),
        in_specs=[
            pl.BlockSpec((1, TT, Cin), lambda b, t: (b, t, 0)),
            pl.BlockSpec((K * CP, CP), lambda b, t: (0, 0)),
            pl.BlockSpec((1, CP), lambda b, t: (0, 0)),
            pl.BlockSpec((K * CP, CP), lambda b, t: (0, 0)),
            pl.BlockSpec((1, CP), lambda b, t: (0, 0)),
            pl.BlockSpec((CP, CP), lambda b, t: (0, 0)),
            pl.BlockSpec((1, CP), lambda b, t: (0, 0)),
        ],
        out_specs=pl.BlockSpec((1, TT, Cout), lambda b, t: (b, t, 0)),
        scratch_shapes=[
            pltpu.VMEM((hpad + TT, CP), jnp.float32),   # x window buffer
            pltpu.VMEM((hpad + TT, CP), jnp.float32),   # conv1-output window buffer
        ],
        compiler_params=pltpu.CompilerParams(
            # batch is parallel (megacore); time must be sequential (history carry)
            dimension_semantics=("parallel", "arbitrary")),
        cost_estimate=pl.CostEstimate(flops=flops, transcendentals=0,
                                      bytes_accessed=bytes_accessed),
    )(x_btc, w1, b1, w2, b2, wd, bd)

    return out[:, :T, :]


# ----------------------------------------------------------------------------
# PyTorch-layout boundary wrapper: (B, C_in, T) f32 -> (B, C_out, T) f32.
# ----------------------------------------------------------------------------
def temporal_block_forward(x_ncl, params, *, kernel_size, dilation, tile_t=256):
    x_btc = jnp.transpose(x_ncl, (0, 2, 1))
    y_btc = temporal_block_btc(x_btc, params, kernel_size=kernel_size,
                               dilation=dilation, tile_t=tile_t)
    return jnp.transpose(y_btc, (0, 2, 1)).astype(jnp.float32)


# ----------------------------------------------------------------------------
# Deterministic parameters (PyTorch storage layout)
# ----------------------------------------------------------------------------
def make_params(key, in_channels, out_channels, kernel_size):
    ks = jax.random.split(key, 6)

    def w(k, shape, fan_in):
        return jax.random.normal(k, shape, jnp.float32) / jnp.sqrt(fan_in)

    p = {
        "conv1_w": w(ks[0], (out_channels, in_channels, kernel_size),
                     in_channels * kernel_size),
        "conv1_b": w(ks[1], (out_channels,), out_channels),
        "conv2_w": w(ks[2], (out_channels, out_channels, kernel_size),
                     out_channels * kernel_size),
        "conv2_b": w(ks[3], (out_channels,), out_channels),
    }
    if in_channels != out_channels:
        p["down_w"] = w(ks[4], (out_channels, in_channels, 1), in_channels)
        p["down_b"] = w(ks[5], (out_channels,), out_channels)
    else:
        p["down_w"] = None
        p["down_b"] = None
    return p


# ----------------------------------------------------------------------------
# Pure-JAX f32 reference (mirrors the PyTorch TemporalBlock, inference mode)
# ----------------------------------------------------------------------------
def reference_forward(x_ncl, p, *, kernel_size, dilation):
    K = kernel_size
    x = jnp.transpose(x_ncl, (0, 2, 1)).astype(jnp.float32)   # (B, T, Cin)
    B, T, _ = x.shape

    def causal_conv(h, w, b, d):          # w: (Cout, Cin, K)
        out = jnp.zeros((B, T, w.shape[0]), jnp.float32) + b
        for j in range(K):
            s = d * (K - 1 - j)
            hs = jnp.pad(h, ((0, 0), (s, 0), (0, 0)))[:, :T, :]
            out = out + jnp.einsum("btc,oc->bto", hs, w[:, :, j])
        return out

    relu = lambda a: jnp.maximum(a, 0.0)
    h = relu(causal_conv(x, p["conv1_w"], p["conv1_b"], dilation))  # dropout1 id
    h = relu(causal_conv(h, p["conv2_w"], p["conv2_b"], dilation))  # dropout2 id
    if p["down_w"] is not None:
        res = jnp.einsum("btc,oc->bto", x, p["down_w"][:, :, 0]) + p["down_b"]
    else:
        res = x
    y = relu(h + res)
    return jnp.transpose(y, (0, 2, 1))    # (B, Cout, T)


if __name__ == "__main__":
    key = jax.random.PRNGKey(0)
    k1, k2, k3, k4 = jax.random.split(key, 4)

    # Case 1 — the spec configuration: TemporalBlock(in=4, out=16, kernel=3,
    # stride=1, dilation=2, padding=(3-1)*2=4, dropout=0.2), inference mode.
    B, Cin, T, Cout, K, DIL = 2, 4, 16, 16, 3, 2
    x = jax.random.normal(k1, (B, Cin, T), jnp.float32)
    params = make_params(k2, Cin, Cout, K)
    y = jax.block_until_ready(
        temporal_block_forward(x, params, kernel_size=K, dilation=DIL))
    ref = reference_forward(x, params, kernel_size=K, dilation=DIL)
    assert y.shape == (B, Cout, T), y.shape
    err = jnp.max(jnp.abs(y - ref))
    # bf16 activations/weights at the matmul (f32 accumulate) vs f32 reference.
    assert jnp.allclose(y, ref, atol=3e-2, rtol=3e-2), f"case1 max err {err}"

    # Case 2 — identity residual (in == out) + multi-tile history carry.
    B, Cin, T, Cout, K, DIL = 2, 8, 40, 8, 3, 1
    x = jax.random.normal(k3, (B, Cin, T), jnp.float32)
    params = make_params(k4, Cin, Cout, K)
    y = jax.block_until_ready(
        temporal_block_forward(x, params, kernel_size=K, dilation=DIL, tile_t=16))
    ref = reference_forward(x, params, kernel_size=K, dilation=DIL)
    assert y.shape == (B, Cout, T), y.shape
    err = jnp.max(jnp.abs(y - ref))
    assert jnp.allclose(y, ref, atol=3e-2, rtol=3e-2), f"case2 max err {err}"

    print("KERNEL_OK")
</pallas_src>

<mosaic_0001>
module attributes {stable_mosaic.version = 11 : i64} {
  func.func @temporal_block_kernel(%arg0: i32, %arg1: i32, %arg2: memref<1x16x4xbf16, #tpu.memory_space<vmem>>, %arg3: memref<384x128xbf16, #tpu.memory_space<vmem>>, %arg4: memref<1x128xf32, #tpu.memory_space<vmem>>, %arg5: memref<384x128xbf16, #tpu.memory_space<vmem>>, %arg6: memref<1x128xf32, #tpu.memory_space<vmem>>, %arg7: memref<128x128xbf16, #tpu.memory_space<vmem>>, %arg8: memref<1x128xf32, #tpu.memory_space<vmem>>, %arg9: memref<1x16x16xf32, #tpu.memory_space<vmem>>, %arg10: memref<24x128xf32, #tpu.memory_space<vmem>>, %arg11: memref<24x128xf32, #tpu.memory_space<vmem>>) attributes {dimension_semantics = [#tpu.dimension_semantics<parallel>, #tpu.dimension_semantics<arbitrary>], iteration_bounds = array<i64: 2, 1>, scalar_prefetch = 0 : i64, scratch_operands = 2 : i64, tpu.core_type = #tpu.core_type<tc>, window_params = [{transform_indices = @transform_0, window_bounds = array<i64: 1, 16, 4>}, {pipeline_mode = #tpu.pipeline_mode<synchronous>, transform_indices = @transform_1, window_bounds = array<i64: 384, 128>}, {pipeline_mode = #tpu.pipeline_mode<synchronous>, transform_indices = @transform_2, window_bounds = array<i64: 1, 128>}, {pipeline_mode = #tpu.pipeline_mode<synchronous>, transform_indices = @transform_3, window_bounds = array<i64: 384, 128>}, {pipeline_mode = #tpu.pipeline_mode<synchronous>, transform_indices = @transform_4, window_bounds = array<i64: 1, 128>}, {pipeline_mode = #tpu.pipeline_mode<synchronous>, transform_indices = @transform_5, window_bounds = array<i64: 128, 128>}, {pipeline_mode = #tpu.pipeline_mode<synchronous>, transform_indices = @transform_6, window_bounds = array<i64: 1, 128>}, {transform_indices = @transform_7, window_bounds = array<i64: 1, 16, 16>}]} {
    %c0_i32 = arith.constant 0 : i32
    %0 = arith.cmpi eq, %arg1, %c0_i32 : i32
    %1 = arith.extui %0 : i1 to i32
    %c0_i32_0 = arith.constant 0 : i32
    %2 = arith.cmpi ne, %1, %c0_i32_0 : i32
    scf.if %2 {
      %cst_50 = arith.constant 0.000000e+00 : f32
      %63 = vector.broadcast %cst_50 : f32 to vector<24x128xf32>
      %c0_51 = arith.constant 0 : index
      %c0_52 = arith.constant 0 : index
      %64 = vector.load %arg10[%c0_51, %c0_52] : memref<24x128xf32, #tpu.memory_space<vmem>>, vector<24x128xf32>
      tpu.vector_store %arg10[%c0_51, %c0_52], %63 {strides = array<i32>} : memref<24x128xf32, #tpu.memory_space<vmem>>, vector<24x128xf32>,
      %cst_53 = arith.constant 0.000000e+00 : f32
      %65 = vector.broadcast %cst_53 : f32 to vector<24x128xf32>
      %c0_54 = arith.constant 0 : index
      %c0_55 = arith.constant 0 : index
      %66 = vector.load %arg11[%c0_54, %c0_55] : memref<24x128xf32, #tpu.memory_space<vmem>>, vector<24x128xf32>
      tpu.vector_store %arg11[%c0_54, %c0_55], %65 {strides = array<i32>} : memref<24x128xf32, #tpu.memory_space<vmem>>, vector<24x128xf32>,
    } else {
    }
    %c0_i32_1 = arith.constant 0 : i32
    %3 = arith.cmpi sgt, %arg1, %c0_i32_1 : i32
    %4 = arith.extui %3 : i1 to i32
    %c0_i32_2 = arith.constant 0 : i32
    %5 = arith.cmpi ne, %4, %c0_i32_2 : i32
    scf.if %5 {
      %c16 = arith.constant 16 : index
      %c0_50 = arith.constant 0 : index
      %63 = vector.load %arg10[%c16, %c0_50] : memref<24x128xf32, #tpu.memory_space<vmem>>, vector<8x128xf32>
      %c0_51 = arith.constant 0 : index
      %c0_52 = arith.constant 0 : index
      %64 = vector.load %arg10[%c0_51, %c0_52] : memref<24x128xf32, #tpu.memory_space<vmem>>, vector<8x128xf32>
      tpu.vector_store %arg10[%c0_51, %c0_52], %63 {strides = array<i32>} : memref<24x128xf32, #tpu.memory_space<vmem>>, vector<8x128xf32>,
      %c16_53 = arith.constant 16 : index
      %c0_54 = arith.constant 0 : index
      %65 = vector.load %arg11[%c16_53, %c0_54] : memref<24x128xf32, #tpu.memory_space<vmem>>, vector<8x128xf32>
      %c0_55 = arith.constant 0 : index
      %c0_56 = arith.constant 0 : index
      %66 = vector.load %arg11[%c0_55, %c0_56] : memref<24x128xf32, #tpu.memory_space<vmem>>, vector<8x128xf32>
      tpu.vector_store %arg11[%c0_55, %c0_56], %65 {strides = array<i32>} : memref<24x128xf32, #tpu.memory_space<vmem>>, vector<8x128xf32>,
    } else {
    }
    %c0 = arith.constant 0 : index
    %c0_3 = arith.constant 0 : index
    %c0_4 = arith.constant 0 : index
    %6 = vector.load %arg2[%c0, %c0_3, %c0_4] : memref<1x16x4xbf16, #tpu.memory_space<vmem>>, vector<1x16x4xbf16>
    %7 = vector.shape_cast %6 : vector<1x16x4xbf16> to vector<16x4xbf16>
    %8 = arith.extf %7 : vector<16x4xbf16> to vector<16x4xf32>
    %c8 = arith.constant 8 : index
    %c0_5 = arith.constant 0 : index
    %9 = vector.load %arg10[%c8, %c0_5] : memref<24x128xf32, #tpu.memory_space<vmem>>, vector<16x4xf32>
    tpu.vector_store %arg10[%c8, %c0_5], %8 {strides = array<i32>} : memref<24x128xf32, #tpu.memory_space<vmem>>, vector<16x4xf32>,
    %c4 = arith.constant 4 : index
    %c0_6 = arith.constant 0 : index
    %10 = vector.load %arg10[%c4, %c0_6] : memref<24x128xf32, #tpu.memory_space<vmem>>, vector<16x128xf32>
    %11 = arith.truncf %10 : vector<16x128xf32> to vector<16x128xbf16>
    %c0_7 = arith.constant 0 : index
    %c0_8 = arith.constant 0 : index
    %12 = vector.load %arg3[%c0_7, %c0_8] : memref<384x128xbf16, #tpu.memory_space<vmem>>, vector<128x128xbf16>
    %cst = arith.constant dense<0.000000e+00> : vector<16x128xf32>
    %13 = tpu.matmul %11, %12, %cst {dimension_numbers = #tpu.dot_dimension_numbers<[1], [0], [0], [1], [0, 0, 1, 1], [], []>} : vector<16x128xbf16>, vector<128x128xbf16>, vector<16x128xf32> -> vector<16x128xf32>
    %c6 = arith.constant 6 : index
    %c0_9 = arith.constant 0 : index
    %14 = vector.load %arg10[%c6, %c0_9] : memref<24x128xf32, #tpu.memory_space<vmem>>, vector<16x128xf32>
    %15 = arith.truncf %14 : vector<16x128xf32> to vector<16x128xbf16>
    %c128 = arith.constant 128 : index
    %c0_10 = arith.constant 0 : index
    %16 = vector.load %arg3[%c128, %c0_10] : memref<384x128xbf16, #tpu.memory_space<vmem>>, vector<128x128xbf16>
    %cst_11 = arith.constant dense<0.000000e+00> : vector<16x128xf32>
    %17 = tpu.matmul %15, %16, %cst_11 {dimension_numbers = #tpu.dot_dimension_numbers<[1], [0], [0], [1], [0, 0, 1, 1], [], []>} : vector<16x128xbf16>, vector<128x128xbf16>, vector<16x128xf32> -> vector<16x128xf32>
    %18 = arith.addf %13, %17 : vector<16x128xf32>
    %c8_12 = arith.constant 8 : index
    %c0_13 = arith.constant 0 : index
    %19 = vector.load %arg10[%c8_12, %c0_13] : memref<24x128xf32, #tpu.memory_space<vmem>>, vector<16x128xf32>
    %20 = arith.truncf %19 : vector<16x128xf32> to vector<16x128xbf16>
    %c256 = arith.constant 256 : index
    %c0_14 = arith.constant 0 : index
    %21 = vector.load %arg3[%c256, %c0_14] : memref<384x128xbf16, #tpu.memory_space<vmem>>, vector<128x128xbf16>
    %cst_15 = arith.constant dense<0.000000e+00> : vector<16x128xf32>
    %22 = tpu.matmul %20, %21, %cst_15 {dimension_numbers = #tpu.dot_dimension_numbers<[1], [0], [0], [1], [0, 0, 1, 1], [], []>} : vector<16x128xbf16>, vector<128x128xbf16>, vector<16x128xf32> -> vector<16x128xf32>
    %23 = arith.addf %18, %22 : vector<16x128xf32>
    %c0_16 = arith.constant 0 : index
    %c0_17 = arith.constant 0 : index
    %24 = vector.load %arg4[%c0_16, %c0_17] : memref<1x128xf32, #tpu.memory_space<vmem>>, vector<1x128xf32>
    %25 = vector.broadcast %24 : vector<1x128xf32> to vector<16x128xf32>
    %26 = arith.addf %23, %25 : vector<16x128xf32>
    %cst_18 = arith.constant 0.000000e+00 : f32
    %27 = vector.broadcast %cst_18 : f32 to vector<16x128xf32>
    %28 = arith.maximumf %26, %27 : vector<16x128xf32>
    %c8_19 = arith.constant 8 : index
    %c0_20 = arith.constant 0 : index
    %29 = vector.load %arg11[%c8_19, %c0_20] : memref<24x128xf32, #tpu.memory_space<vmem>>, vector<16x128xf32>
    tpu.vector_store %arg11[%c8_19, %c0_20], %28 {strides = array<i32>} : memref<24x128xf32, #tpu.memory_space<vmem>>, vector<16x128xf32>,
    %c4_21 = arith.constant 4 : index
    %c0_22 = arith.constant 0 : index
    %30 = vector.load %arg11[%c4_21, %c0_22] : memref<24x128xf32, #tpu.memory_space<vmem>>, vector<16x128xf32>
    %31 = arith.truncf %30 : vector<16x128xf32> to vector<16x128xbf16>
    %c0_23 = arith.constant 0 : index
    %c0_24 = arith.constant 0 : index
    %32 = vector.load %arg5[%c0_23, %c0_24] : memref<384x128xbf16, #tpu.memory_space<vmem>>, vector<128x128xbf16>
    %cst_25 = arith.constant dense<0.000000e+00> : vector<16x128xf32>
    %33 = tpu.matmul %31, %32, %cst_25 {dimension_numbers = #tpu.dot_dimension_numbers<[1], [0], [0], [1], [0, 0, 1, 1], [], []>} : vector<16x128xbf16>, vector<128x128xbf16>, vector<16x128xf32> -> vector<16x128xf32>
    %c6_26 = arith.constant 6 : index
    %c0_27 = arith.constant 0 : index
    %34 = vector.load %arg11[%c6_26, %c0_27] : memref<24x128xf32, #tpu.memory_space<vmem>>, vector<16x128xf32>
    %35 = arith.truncf %34 : vector<16x128xf32> to vector<16x128xbf16>
    %c128_28 = arith.constant 128 : index
    %c0_29 = arith.constant 0 : index
    %36 = vector.load %arg5[%c128_28, %c0_29] : memref<384x128xbf16, #tpu.memory_space<vmem>>, vector<128x128xbf16>
    %cst_30 = arith.constant dense<0.000000e+00> : vector<16x128xf32>
    %37 = tpu.matmul %35, %36, %cst_30 {dimension_numbers = #tpu.dot_dimension_numbers<[1], [0], [0], [1], [0, 0, 1, 1], [], []>} : vector<16x128xbf16>, vector<128x128xbf16>, vector<16x128xf32> -> vector<16x128xf32>
    %38 = arith.addf %33, %37 : vector<16x128xf32>
    %c8_31 = arith.constant 8 : index
    %c0_32 = arith.constant 0 : index
    %39 = vector.load %arg11[%c8_31, %c0_32] : memref<24x128xf32, #tpu.memory_space<vmem>>, vector<16x128xf32>
    %40 = arith.truncf %39 : vector<16x128xf32> to vector<16x128xbf16>
    %c256_33 = arith.constant 256 : index
    %c0_34 = arith.constant 0 : index
    %41 = vector.load %arg5[%c256_33, %c0_34] : memref<384x128xbf16, #tpu.memory_space<vmem>>, vector<128x128xbf16>
    %cst_35 = arith.constant dense<0.000000e+00> : vector<16x128xf32>
    %42 = tpu.matmul %40, %41, %cst_35 {dimension_numbers = #tpu.dot_dimension_numbers<[1], [0], [0], [1], [0, 0, 1, 1], [], []>} : vector<16x128xbf16>, vector<128x128xbf16>, vector<16x128xf32> -> vector<16x128xf32>
    %43 = arith.addf %38, %42 : vector<16x128xf32>
    %c0_36 = arith.constant 0 : index
    %c0_37 = arith.constant 0 : index
    %44 = vector.load %arg6[%c0_36, %c0_37] : memref<1x128xf32, #tpu.memory_space<vmem>>, vector<1x128xf32>
    %45 = vector.broadcast %44 : vector<1x128xf32> to vector<16x128xf32>
    %46 = arith.addf %43, %45 : vector<16x128xf32>
    %cst_38 = arith.constant 0.000000e+00 : f32
    %47 = vector.broadcast %cst_38 : f32 to vector<16x128xf32>
    %48 = arith.maximumf %46, %47 : vector<16x128xf32>
    %c8_39 = arith.constant 8 : index
    %c0_40 = arith.constant 0 : index
    %49 = vector.load %arg10[%c8_39, %c0_40] : memref<24x128xf32, #tpu.memory_space<vmem>>, vector<16x128xf32>
    %50 = arith.truncf %49 : vector<16x128xf32> to vector<16x128xbf16>
    %c0_41 = arith.constant 0 : index
    %c0_42 = arith.constant 0 : index
    %51 = vector.load %arg7[%c0_41, %c0_42] : memref<128x128xbf16, #tpu.memory_space<vmem>>, vector<128x128xbf16>
    %cst_43 = arith.constant dense<0.000000e+00> : vector<16x128xf32>
    %52 = tpu.matmul %50, %51, %cst_43 {dimension_numbers = #tpu.dot_dimension_numbers<[1], [0], [0], [1], [0, 0, 1, 1], [], []>} : vector<16x128xbf16>, vector<128x128xbf16>, vector<16x128xf32> -> vector<16x128xf32>
    %c0_44 = arith.constant 0 : index
    %c0_45 = arith.constant 0 : index
    %53 = vector.load %arg8[%c0_44, %c0_45] : memref<1x128xf32, #tpu.memory_space<vmem>>, vector<1x128xf32>
    %54 = vector.broadcast %53 : vector<1x128xf32> to vector<16x128xf32>
    %55 = arith.addf %52, %54 : vector<16x128xf32>
    %56 = arith.addf %48, %55 : vector<16x128xf32>
    %cst_46 = arith.constant 0.000000e+00 : f32
    %57 = vector.broadcast %cst_46 : f32 to vector<16x128xf32>
    %58 = arith.maximumf %56, %57 : vector<16x128xf32>
    %59 = vector.extract_strided_slice %58 {offsets = [0, 0], sizes = [16, 16], strides = [1, 1]} : vector<16x128xf32> to vector<16x16xf32>
    %c0_47 = arith.constant 0 : index
    %c0_48 = arith.constant 0 : index
    %c0_49 = arith.constant 0 : index
    %60 = vector.load %arg9[%c0_47, %c0_48, %c0_49] : memref<1x16x16xf32, #tpu.memory_space<vmem>>, vector<1x16x16xf32>
    %61 = vector.shape_cast %60 : vector<1x16x16xf32> to vector<16x16xf32>
    %62 = vector.shape_cast %59 : vector<16x16xf32> to vector<1x16x16xf32>
    tpu.vector_store %arg9[%c0_47, %c0_48, %c0_49], %62 {strides = array<i32>} : memref<1x16x16xf32, #tpu.memory_space<vmem>>, vector<1x16x16xf32>,
    return
  }
  func.func @transform_0(%arg0: i32, %arg1: i32) -> (i32, i32, i32) {
    %c0_i32 = arith.constant 0 : i32
    %c0_i32_0 = arith.constant 0 : i32
    return %arg0, %arg1, %c0_i32 : i32, i32, i32
  }
  func.func @transform_1(%arg0: i32, %arg1: i32) -> (i32, i32) {
    %c0_i32 = arith.constant 0 : i32
    %c0_i32_0 = arith.constant 0 : i32
    %c0_i32_1 = arith.constant 0 : i32
    return %c0_i32, %c0_i32_0 : i32, i32
  }
  func.func @transform_2(%arg0: i32, %arg1: i32) -> (i32, i32) {
    %c0_i32 = arith.constant 0 : i32
    %c0_i32_0 = arith.constant 0 : i32
    %c0_i32_1 = arith.constant 0 : i32
    return %c0_i32, %c0_i32_0 : i32, i32
  }
  func.func @transform_3(%arg0: i32, %arg1: i32) -> (i32, i32) {
    %c0_i32 = arith.constant 0 : i32
    %c0_i32_0 = arith.constant 0 : i32
    %c0_i32_1 = arith.constant 0 : i32
    return %c0_i32, %c0_i32_0 : i32, i32
  }
  func.func @transform_4(%arg0: i32, %arg1: i32) -> (i32, i32) {
    %c0_i32 = arith.constant 0 : i32
    %c0_i32_0 = arith.constant 0 : i32
    %c0_i32_1 = arith.constant 0 : i32
    return %c0_i32, %c0_i32_0 : i32, i32
  }
  func.func @transform_5(%arg0: i32, %arg1: i32) -> (i32, i32) {
    %c0_i32 = arith.constant 0 : i32
    %c0_i32_0 = arith.constant 0 : i32
    %c0_i32_1 = arith.constant 0 : i32
    return %c0_i32, %c0_i32_0 : i32, i32
  }
  func.func @transform_6(%arg0: i32, %arg1: i32) -> (i32, i32) {
    %c0_i32 = arith.constant 0 : i32
    %c0_i32_0 = arith.constant 0 : i32
    %c0_i32_1 = arith.constant 0 : i32
    return %c0_i32, %c0_i32_0 : i32, i32
  }
  func.func @transform_7(%arg0: i32, %arg1: i32) -> (i32, i32, i32) {
    %c0_i32 = arith.constant 0 : i32
    %c0_i32_0 = arith.constant 0 : i32
    return %arg0, %arg1, %c0_i32 : i32, i32, i32
  }
}

</mosaic_0001>

<bundles_post_ra>
// kernel: tpu_custom_call.1
= control target key start
LH: loop header
LB: loop body
LE: loop exit
PB: predicated region body
PF: predicated region fallthrough
CT: control target
= control target key end

     0   :  { %s1889_s0 = inlined_call_operand.vmem [shape: bf16[2,16,4], index: 0, kind: input, shape index: {}]   ;;  %s1890_s1 = inlined_call_operand.hbm [shape: bf16[384,128], index: 1, kind: input, shape index: {}]   ;;  %s1891_s2 = inlined_call_operand.vmem [shape: f32[1,128], index: 2, kind: input, shape index: {}]   ;;  %s1892_s3 = inlined_call_operand.hbm [shape: bf16[384,128], index: 3, kind: input, shape index: {}]   ;;  %s1893_s4 = inlined_call_operand.vmem [shape: f32[1,128], index: 4, kind: input, shape index: {}]   ;;  %s1894_s5 = inlined_call_operand.hbm [shape: bf16[128,128], index: 5, kind: input, shape index: {}]   ;;  %s1895_s6 = inlined_call_operand.vmem [shape: f32[1,128], index: 6, kind: input, shape index: {}]   ;;  %s1896_s7 = inlined_call_operand.hbm [shape: f32[2,16,16], index: 7, kind: output, shape index: {}]  }
   0x1   :  { %1899 = sst [smem:[#allocation17_spill]] %s1892_s3 }
   0x2   :  { %12 = vsyncpa [#allocation5], 0 }
   0x3   :  { %13 = vsyncpa [#allocation8], 0 }
   0x4   :  { %14 = vsyncpa [#allocation6], 0 }
   0x5   :  { %16 = vsyncpa [#allocation6 + $0x1], 0  ;;  %s1736_s24 = smov 0   ;;  %s1738_s25 = smov 0  }
   0x6   :  { %s1740_s26 = smov 0   ;;  %s1742_s27 = smov 0  }
   0x7   :  { %s1744_s28 = smov 0   ;;  %s1746_s29 = smov 0  }
   0x8 LB: > { %1900 = sst [smem:[#allocation14_spill]] %s1682_s28  ;;  %s1111_s30 = sadd.s32 4294967295, %s1686_s29   ;;  %s1686_s29 = sphi %s1746_s29, %s22_s29   ;;  %s1682_s28 = sphi %s1744_s28, %s1911_s28   ;;  %s1678_s27 = sphi %s1742_s27, %s1910_s27   ;;  %s1674_s26 = sphi %s1740_s26, %s1914_s26   ;;  %s1670_s25 = sphi %s1738_s25, %s1913_s25   ;;  %s1666_s24 = sphi %s1736_s24, %s1912_s24  }
   0x9   : > { %s1112_s8 = sadd.s32 4294967294, %s1686_s29   ;;  %s34_s9 = sadd.s32 1, %s1682_s28 }
   0xa   : > { %s197_s10 = sadd.s32 1, %s1674_s26  ;;  %p36_p0 = scmp.ge.s32.totalorder %s34_s9, 2 }
   0xb   : > { %p207_p1 = scmp.ne.s32.totalorder %s1674_s26, %s1670_s25  ;;  %p208_p2 = scmp.eq.s32.totalorder %s1111_s30, 1 }
   0xc   : > { %p213_p3 = scmp.ne.s32.totalorder %s1670_s25, %s1666_s24  ;;  %s1916_s9 = smov (%p36_p0, %s34_s9), 0 }
   0xd   : > { %1901 = sst [smem:[#allocation15_spill]] %s1916_s9  ;;  %p1776_p4 = por %p208_p2, %p207_p1 }
   0xe   : > { %p214_p5 = scmp.eq.s32.totalorder %s1112_s8, 1  ;;  %s192_s12 = ssub.s32 %s1682_s28, %s1916_s9 }
   0xf   : > { %p1113_p6 = scmp.ge.s32.totalorder %s1686_s29, 1  ;;  %p195_p7 = scmp.eq.s32.totalorder %s192_s12, 0 }
  0x10   : > { %p1783_p8 = por %p214_p5, %p213_p3  ;;  %p221_p9 = scmp.lt.s32.totalorder %s1686_s29, 3 }
  0x11   : > { %s1789_s14 = scalar_select %p195_p7, %s1674_s26, %s197_s10  }
  0x12   : > { %p1791_p10 = pnand %p1113_p6, %p221_p9  ;;  %p1795_p11 = scmp.eq.s32.totalorder %s1111_s30, 0 }
  0x13   : > { %1904 = sst [smem:[#allocation16_spill]] %s1789_s14  ;;  %s1688_s21 = smov [#allocation7]  }
  0x14   : > { %p1430_p12 = pneg %p1791_p10  ;;  %s1907_s3 = sld [smem:[#allocation17_spill]] }
  0x15   : > { %s251_s22 = sshll.u32 %s1688_s21, 4  ;;  %s1689_s23 = smov 64   ;;  %s252_s22 = int_to_ptr.vmem [resolvable:$true] %s251_s22 }
  0x16   : > { %p1806_p13 = pnand %p1795_p11, %p1430_p12  ;;  %s1690_s30 = smov 4  }
  0x17   : > { %s232_s12 = sshll.u32 %s1890_s1, 4  ;;  %s1691_s17 = smov [#allocation4]   ;;  %s233_s12 = int_to_ptr.hbm [resolvable:$true] %s232_s12 }
  0x18   : > { %s234_s18 = sshll.u32 %s1691_s17, 4  ;;  %s266_s28 = sshll.u32 %s1894_s5, 4  ;;  %s235_s18 = int_to_ptr.vmem [resolvable:$true] %s234_s18  ;;  %s267_s28 = int_to_ptr.hbm [resolvable:$true] %s266_s28 }
  0x19   : > { %1433 = dma.hbm_to_vmem [thread:$0]  (!%p1806_p13), %s233_s12, 3072, %s235_s18, [#allocation5], %s1689_s23, %s1689_s23, %s1690_s30  }
  0x1a   : > { %s249_s19 = sshll.u32 %s1907_s3, 4  ;;  %s1692_s21 = smov [#allocation9]   ;;  %s250_s19 = int_to_ptr.hbm [resolvable:$true] %s249_s19 }
  0x1b   : > { %1436 = dma.hbm_to_vmem [thread:$0]  (!%p1806_p13), %s250_s19, 3072, %s252_s22, [#allocation8], %s1689_s23, %s1689_s23, %s1690_s30  }
  0x1c   : > { %s268_s14 = sshll.u32 %s1692_s21, 4  ;;  %300 = sbr.rel (%p1791_p10) target bundleno = 382 (0x17e), region = 48  ;;  %s269_s14 = int_to_ptr.vmem [resolvable:$true] %s268_s14 }
  0x1d   : > { %1439 = dma.hbm_to_vmem [thread:$0]  (!%p1806_p13), %s267_s28, 1024, %s269_s14, [#allocation8], %s1689_s23, %s1689_s23, %s1690_s30  }
  0x21   : > { %1653 = dma.done.wait (%p1795_p11), [#allocation5], 3072  }
  0x22   : > { %1655 = vsyncadd (%p1795_p11), [#allocation5], 4294964224 }
  0x23   : > { %1657 = dma.done.wait (%p1795_p11), [#allocation8], 4096  }
  0x24   : > { %1659 = vsyncadd (%p1795_p11), [#allocation8], 4294963200  ;;  %p348_p0 = scmp.lt.s32.totalorder %s1678_s27, 1  ;;  %v1693_v0 = vmov 0.0   ;;  %v1370_v1 = vld [vmem:[#allocation4 + $0x78] sm:$0xff]  ;;  %v1369_v4 = vld [vmem:[#allocation4 + $0x70] sm:$0xff] }
  0x25   : > { %362 = vst [vmem:[#allocation2] sm:$0xff] %v1693_v0  ;;  %v1362_v2 = vld [vmem:[#allocation4 + $0x38] sm:$0xff]  ;;  %469 = vmatpush.bf16.msra.mxu0 %v1370_v1  ;;  %v1361_v5 = vld [vmem:[#allocation4 + $0x30] sm:$0xff]  ;;  %v1368_v7 = vld [vmem:[#allocation4 + $0x68] sm:$0xff]  ;;  %vm380_vm0 = vcmask 31744   ;;  %s344_s8 = sand.u32 1, %s1670_s25  }
  0x26   : > { %363 = vst [vmem:[#allocation2 + $0x8] sm:$0xff] %v1693_v0  ;;  %s349_s3 = scalar_select %p348_p0, %s1678_s27, 1  ;;  %v1378_v3 = vld [vmem:[#allocation4 + $0xb8] sm:$0xff]  ;;  %531 = vmatpush.bf16.msra.mxu1 %v1362_v2  ;;  %v1377_v6 = vld [vmem:[#allocation4 + $0xb0] sm:$0xff]  ;;  %v1360_v8 = vld [vmem:[#allocation4 + $0x28] sm:$0xff]  ;;  %vm980_vm1 = vcmask 130048  }
  0x27   : > { %364 = vst [vmem:[#allocation2 + $0x10] sm:$0xff] %v1693_v0  ;;  %612 = vmatpush.bf16.msra.mxu2 %v1378_v3  ;;  %v1376_v9 = vld [vmem:[#allocation4 + $0xa8] sm:$0xff]  ;;  %v1367_v13 = vld [vmem:[#allocation4 + $0x60] sm:$0xff]  ;;  %v1366_v16 = vld [vmem:[#allocation4 + $0x58] sm:$0xff]  ;;  %s1122_s10 = sshll.u32 %s344_s8, 4  ;;  %s1411_s12 = sshll.u32 %s1678_s27, 4 }
  0x28   : > { %365 = vst [vmem:[#allocation3] sm:$0xff] %v1693_v0  ;;  %s1354_s28 = sshll.u32 %s349_s3, 3  ;;  %v1359_v14 = vld [vmem:[#allocation4 + $0x20] sm:$0xff]  ;;  %v1358_v17 = vld [vmem:[#allocation4 + $0x18] sm:$0xff]  ;;  %v1365_v19 = vld [vmem:[#allocation4 + $0x50] sm:$0xff]  ;;  %s997_s21 = scalar_lea.hbm %s1896_s7, %s1411_s12 }
  0x29   : > { %s355_s15 = scalar_lea.vmem %s1889_s0, %s1354_s28  ;;  %470 = vmatpush.bf16.msra.mxu0 %v1369_v4  ;;  %v1375_v15 = vld [vmem:[#allocation4 + $0xa0] sm:$0xff]  ;;  %v1374_v18 = vld [vmem:[#allocation4 + $0x98] sm:$0xff]  ;;  %v1357_v20 = vld [vmem:[#allocation4 + $0x10] sm:$0xff]  ;;  %s346_s3 = scalar_lea.vmem [#allocation10], %s1122_s10 }
  0x2a   : > { %532 = vmatpush.bf16.msra.mxu1 %v1361_v5  ;;  %v1413_v10 = vld [vmem:[%s355_s15] sm:$0xff]   ;;  %v1364_v22 = vld [vmem:[#allocation4 + $0x48] sm:$0xff]  ;;  %v1363_v25 = vld [vmem:[#allocation4 + $0x40] sm:$0xff]  ;;  %s998_s28 = sshll.u32 %s346_s3, 4  ;;  %s1000_s9 = sshll.u32 %s997_s21, 4  ;;  %s999_s28 = int_to_ptr.vmem [resolvable:$true] %s998_s28  ;;  %s1001_s9 = int_to_ptr.hbm [resolvable:$true] %s1000_s9 }
  0x2b   : > { %613 = vmatpush.bf16.msra.mxu2 %v1377_v6  ;;  %v1414_v11 = vunpack.c.l.bf16 %v1413_v10  ;;  %v1415_v12 = vunpack.c.h.bf16 %v1413_v10  ;;  %v1373_v21 = vld [vmem:[#allocation4 + $0x90] sm:$0xff]  ;;  %v1356_v23 = vld [vmem:[#allocation4 + $0x8] sm:$0xff]  ;;  %v1355_v26 = vld [vmem:[#allocation4] sm:$0xff]  ;;  %s984_s27 = scalar_lea.sflag [#allocation6], %s344_s8  ;;  %s1614_s14 = sshra.s32 %s1001_s9, 4  ;;  %s1615_s14 = int_to_ptr.hbm [resolvable:$true] %s1614_s14 }
  0x2c   : > { %v1372_v24 = vld [vmem:[#allocation4 + $0x88] sm:$0xff]  ;;  %v1371_v31 = vld [vmem:[#allocation4 + $0x80] sm:$0xff]  ;;  %v1410_v34 = vld [vmem:[#allocation9 + $0x38] sm:$0xff]  ;;  %s1616_s15 = scalar_lea.hbm %s1615_s14, 16  ;;  %s1620_s20 = scalar_lea.hbm %s1896_s7, 32 }
  0x2d   : > { %471 = vmatpush.bf16.msra.mxu0 %v1368_v7  ;;  %381 = vst.msk [vmem:[#allocation2 + $0x8] sm:$0xff] %vm380_vm0, %v1414_v11  ;;  %v1402_v38 = vld [vmem:[#allocation7 + $0xb8] sm:$0xff]  ;;  %v1401_v39 = vld [vmem:[#allocation7 + $0xb0] sm:$0xff]  ;;  %v1400_v42 = vld [vmem:[#allocation7 + $0xa8] sm:$0xff]  ;;  %p1617_p1 = scmp.ne.s32.totalorder %s1615_s14, %s1616_s15  ;;  %p1621_p5 = scmp.lt.s32.totalorder %s1615_s14, %s1896_s7 }
  0x2e   : > { %533 = vmatpush.bf16.msra.mxu1 %v1360_v8  ;;  %382 = vst.msk [vmem:[#allocation2 + $0x10] sm:$0xff] %vm380_vm0, %v1415_v12  ;;  %v1394_v40 = vld [vmem:[#allocation7 + $0x78] sm:$0xff]  ;;  %v1409_v43 = vld [vmem:[#allocation9 + $0x30] sm:$0xff]  ;;  %v1399_v46 = vld [vmem:[#allocation7 + $0xa0] sm:$0xff]  ;;  %p1622_p6 = scmp.lt.s32.totalorder %s1620_s20, %s1616_s15 }
  0x2f   : > { %614 = vmatpush.bf16.msra.mxu2 %v1376_v9  ;;  %v1386_v41 = vld [vmem:[#allocation7 + $0x38] sm:$0xff]  ;;  %724 = vmatpush.bf16.msra.mxu3 %v1394_v40  ;;  %v1393_v44 = vld [vmem:[#allocation7 + $0x70] sm:$0xff]  ;;  %v1408_v47 = vld [vmem:[#allocation9 + $0x28] sm:$0xff]  ;;  %p1618_p2 = pnand %p1617_p1, %p1776_p4 }
  0x30   : > { %v1385_v45 = vld [vmem:[#allocation7 + $0x30] sm:$0xff]  ;;  %v1392_v48 = vld [vmem:[#allocation7 + $0x68] sm:$0xff]  ;;  %v1398_v50 = vld [vmem:[#allocation7 + $0x98] sm:$0xff]  ;;  %p1623_p7 = por %p1622_p6, %p1621_p5 }
  0x31   : > { %472 = vmatpush.bf16.msra.mxu0 %v1367_v13  ;;  %v1384_v49 = vld [vmem:[#allocation7 + $0x28] sm:$0xff]  ;;  %v1407_v51 = vld [vmem:[#allocation9 + $0x20] sm:$0xff]  ;;  %v1397_v54 = vld [vmem:[#allocation7 + $0x90] sm:$0xff]  ;;  %p1619_p3 = pneg %p1618_p2 }
  0x32   : > { %534 = vmatpush.bf16.msra.mxu1 %v1359_v14  ;;  %v1391_v52 = vld [vmem:[#allocation7 + $0x60] sm:$0xff]  ;;  %v1406_v55 = vld [vmem:[#allocation9 + $0x18] sm:$0xff]  ;;  %v1396_v58 = vld [vmem:[#allocation7 + $0x88] sm:$0xff] }
  0x33   : > { %615 = vmatpush.bf16.msra.mxu2 %v1375_v15  ;;  %725 = vmatpush.bf16.msra.mxu3 %v1393_v44  ;;  %v1383_v53 = vld [vmem:[#allocation7 + $0x20] sm:$0xff]  ;;  %v1390_v56 = vld [vmem:[#allocation7 + $0x58] sm:$0xff]  ;;  %v1405_v59 = vld [vmem:[#allocation9 + $0x10] sm:$0xff]  ;;  %p1624_p9 = pnand %p1623_p7, %p1619_p3 }
  0x34   : > { %v402_v27 = vld [vmem:[#allocation2 + $0x6] sm:$0xff]  ;;  %v1395_v62 = vld [vmem:[#allocation7 + $0x80] sm:$0xff]  ;;  %v1404_v63 = vld [vmem:[#allocation9 + $0x8] sm:$0xff] }
  0x35   : > { %473 = vmatpush.bf16.msra.mxu0 %v1366_v16  ;;  %v403_v28 = vld [vmem:[#allocation2 + $0xe] sm:$0xff]  ;;  %v383_v29 = vld [vmem:[#allocation2 + $0x4] sm:$0xff]  ;;  %v1388_v0 = vld [vmem:[#allocation7 + $0x48] sm:$0xff] }
  0x36   : > { %535 = vmatpush.bf16.msra.mxu1 %v1358_v17  ;;  %v384_v30 = vld [vmem:[#allocation2 + $0xc] sm:$0xff]  ;;  %v404_v35 = vpack.c.bf16 %v403_v28, %v402_v27  ;;  %v1389_v60 = vld [vmem:[#allocation7 + $0x50] sm:$0xff]  ;;  %v1380_v1 = vld [vmem:[#allocation7 + $0x8] sm:$0xff] }
  0x37   : > { %616 = vmatpush.bf16.msra.mxu2 %v1374_v18  ;;  %v545_v32 = vld [vmem:[#allocation2 + $0x8] sm:$0xff]  ;;  %v546_v33 = vld [vmem:[#allocation2 + $0x10] sm:$0xff]  ;;  %v385_v36 = vpack.c.bf16 %v384_v30, %v383_v29  ;;  %726 = vmatpush.bf16.msra.mxu3 %v1392_v48  ;;  %v1381_v61 = vld [vmem:[#allocation7 + $0x10] sm:$0xff] }
  0x38   : > { %v1837_v37 = vpack.c.bf16 %v546_v33, %v545_v32  ;;  %v1382_v57 = vld [vmem:[#allocation7 + $0x18] sm:$0xff]  ;;  %v1403_v2 = vld [vmem:[#allocation9] sm:$0xff]  ;;  %v1507_v8 = vld [vmem:[%s1891_s2] ss:$0 sm:$0xff] }
  0x39   : > { %474 = vmatpush.bf16.msra.mxu0 %v1365_v19  ;;  %v1387_v3 = vld [vmem:[#allocation7 + $0x40] sm:$0xff]  ;;  %v1508_v30 = vld [vmem:[%s1895_s6] ss:$0 sm:$0xff] }
  0x3a   : > { %536 = vmatpush.bf16.msra.mxu1 %v1357_v20  ;;  %v1379_v4 = vld [vmem:[#allocation7] sm:$0xff]  ;;  %v1509_v32 = vld [vmem:[%s1893_s4] ss:$0 sm:$0xff] }
  0x3b   : > { %617 = vmatpush.bf16.msra.mxu2 %v1373_v21  ;;  %727 = vmatpush.bf16.msra.mxu3 %v1391_v52 }
  0x3d   : > { %475 = vmatpush.bf16.msra.mxu0 %v1364_v22 }
  0x3e   : > { %537 = vmatpush.bf16.msra.mxu1 %v1356_v23 }
  0x3f   : > { %618 = vmatpush.bf16.msra.mxu2 %v1372_v24  ;;  %728 = vmatpush.bf16.msra.mxu3 %v1390_v56 }
  0x41   : > { %476 = vmatpush.bf16.msra.mxu0 %v1363_v25 }
  0x42   : > { %538 = vmatpush.bf16.msra.mxu1 %v1355_v26 }
  0x43   : > { %619 = vmatpush.bf16.msra.mxu2 %v1371_v31  ;;  %729 = vmatpush.bf16.msra.mxu3 %v1389_v60 }
  0x44   : > { %477 = vmatmul.bf16.vlgmr.msra.gmra.mxu0 %v404_v35 }
  0x45   : > { %539 = vmatmul.bf16.vlgmr.msra.gmra.mxu1 %v385_v36  ;;  %786 = vmatpush.bf16.msrb.mxu0 %v1386_v41 }
  0x46   : > { %620 = vmatmul.bf16.vlgmr.msra.gmra.mxu2 %v1837_v37  ;;  %867 = vmatpush.bf16.msrb.mxu1 %v1402_v38 }
  0x47   : > { %962 = vmatpush.bf16.msrb.mxu2 %v1410_v34  ;;  %730 = vmatpush.bf16.msra.mxu3 %v1388_v0 }
  0x49   : > { %787 = vmatpush.bf16.msrb.mxu0 %v1385_v45 }
  0x4a   : > { %868 = vmatpush.bf16.msrb.mxu1 %v1401_v39 }
  0x4b   : > { %963 = vmatpush.bf16.msrb.mxu2 %v1409_v43  ;;  %731 = vmatpush.bf16.msra.mxu3 %v1387_v3 }
  0x4d   : > { %788 = vmatpush.bf16.msrb.mxu0 %v1384_v49 }
  0x4e   : > { %869 = vmatpush.bf16.msrb.mxu1 %v1400_v42 }
  0x4f   : > { %964 = vmatpush.bf16.msrb.mxu2 %v1408_v47 }
  0x51   : > { %789 = vmatpush.bf16.msrb.mxu0 %v1383_v53 }
  0x52   : > { %870 = vmatpush.bf16.msrb.mxu1 %v1399_v46 }
  0x53   : > { %965 = vmatpush.bf16.msrb.mxu2 %v1407_v51 }
  0x55   : > { %790 = vmatpush.bf16.msrb.mxu0 %v1382_v57 }
  0x56   : > { %871 = vmatpush.bf16.msrb.mxu1 %v1398_v50 }
  0x57   : > { %966 = vmatpush.bf16.msrb.mxu2 %v1406_v55 }
  0x59   : > { %791 = vmatpush.bf16.msrb.mxu0 %v1381_v61 }
  0x5a   : > { %872 = vmatpush.bf16.msrb.mxu1 %v1397_v54 }
  0x5b   : > { %967 = vmatpush.bf16.msrb.mxu2 %v1405_v59 }
  0x5d   : > { %792 = vmatpush.bf16.msrb.mxu0 %v1380_v1 }
  0x5e   : > { %873 = vmatpush.bf16.msrb.mxu1 %v1396_v58 }
  0x5f   : > { %968 = vmatpush.bf16.msrb.mxu2 %v1404_v63 }
  0x61   : > { %793 = vmatpush.bf16.msrb.mxu0 %v1379_v4 }
  0x62   : > { %874 = vmatpush.bf16.msrb.mxu1 %v1395_v62 }
  0x63   : > { %969 = vmatpush.bf16.msrb.mxu2 %v1403_v2 }
  0x66   : > { %970 = vmatmul.bf16.vlgmr.msrb.gmra.mxu2 %v1837_v37 }
  0xc1   : > { %v478_v5 = vpop.f32.mrf.mxu0 }
  0xc2   : > { %v540_v6 = vpop.f32.mrf.mxu1 }
  0xc3   : > { %v541_v7 = vadd.f32 %v540_v6, %v478_v5 }
  0xc9   : > { %v621_v9 = vpop.f32.mrf.mxu2  ;;  %v480_v12 = vpop.f32.mrf.mxu0 }
  0xca   : > { %v626_v10 = vadd.f32 %v621_v9, %v541_v7  ;;  %v542_v13 = vpop.f32.mrf.mxu1 }
  0xcb   : > { %v543_v15 = vadd.f32 %v542_v13, %v480_v12 }
  0xcc   : > { %v632_v11 = vadd.f32 %v1507_v8, %v626_v10 }
  0xce   : > { %v634_v14 = vmax.f32 %v632_v11, 0.0 }
  0xd0   : > { %636 = vst [vmem:[#allocation3 + $0x8] sm:$0xff] %v634_v14 }
  0xd1   : > { %v623_v16 = vpop.f32.mrf.mxu2 }
  0xd2   : > { %v627_v17 = vadd.f32 %v623_v16, %v543_v15 }
  0xd4   : > { %v633_v18 = vadd.f32 %v1507_v8, %v627_v17 }
  0xd6   : > { %v635_v19 = vmax.f32 %v633_v18, 0.0 }
  0xd7   : > { %v657_v21 = vld [vmem:[#allocation3 + $0x6] sm:$0xff] }
  0xd8   : > { %637 = vst [vmem:[#allocation3 + $0x10] sm:$0xff] %v635_v19  ;;  %v802_v20 = vpack.c.bf16 %v635_v19, %v634_v14  ;;  %v638_v23 = vld [vmem:[#allocation3 + $0x4] sm:$0xff] }
  0xda   : > { %875 = vmatmul.bf16.vlgmr.msrb.gmra.mxu1 %v802_v20 }
  0xdf   : > { %v658_v22 = vld [vmem:[#allocation3 + $0xe] sm:$0xff] }
  0xe0   : > { %v639_v24 = vld [vmem:[#allocation3 + $0xc] sm:$0xff]  ;;  %v659_v25 = vpack.c.bf16 %v658_v22, %v657_v21 }
  0xe1   : > { %v640_v26 = vpack.c.bf16 %v639_v24, %v638_v23 }
  0xe2   : > { %732 = vmatmul.bf16.vlgmr.msra.gmra.mxu3 %v659_v25 }
  0xe3   : > { %794 = vmatmul.bf16.vlgmr.msrb.gmra.mxu0 %v640_v26 }
  0xe9   : > { %v971_v33 = vpop.f32.mrf.mxu2 }
  0xea   : > { %v972_v35 = vadd.f32 %v1508_v30, %v971_v33 }
  0xf1   : > { %v973_v45 = vpop.f32.mrf.mxu2 }
  0xf2   : > { %v974_v47 = vadd.f32 %v1508_v30, %v973_v45 }
 0x157   : > { %v876_v28 = vpop.f32.mrf.mxu1 }
 0x15f   : > { %v878_v42 = vpop.f32.mrf.mxu1 }
 0x160   : > { %v795_v27 = vpop.f32.mrf.mxu0 }
 0x165   : > { %v733_v29 = vpop.f32.mrf.mxu3 }
 0x166   : > { %v796_v31 = vadd.f32 %v795_v27, %v733_v29 }
 0x168   : > { %v881_v34 = vadd.f32 %v876_v28, %v796_v31  ;;  %v797_v38 = vpop.f32.mrf.mxu0 }
 0x16a   : > { %v887_v36 = vadd.f32 %v1509_v32, %v881_v34 }
 0x16c   : > { %v889_v37 = vmax.f32 %v887_v36, 0.0 }
 0x16d   : > { %v735_v39 = vpop.f32.mrf.mxu3 }
 0x16e   : > { %v976_v40 = vadd.f32 %v972_v35, %v889_v37  ;;  %v798_v41 = vadd.f32 %v797_v38, %v735_v39 }
 0x170   : > { %v978_v43 = vmax.f32 %v976_v40, 0.0  ;;  %v882_v44 = vadd.f32 %v878_v42, %v798_v41 }
 0x172   : > { %v888_v46 = vadd.f32 %v1509_v32, %v882_v44  ;;  %981 = vst.msk [vmem:[%s346_s3] sm:$0xff] %vm980_vm1, %v978_v43 }
 0x174   : > { %v890_v48 = vmax.f32 %v888_v46, 0.0 }
 0x176   : > { %v977_v49 = vadd.f32 %v974_v47, %v890_v48 }
 0x178   : > { %v979_v50 = vmax.f32 %v977_v49, 0.0 }
 0x17a   : > { %982 = vst.msk [vmem:[%s346_s3 + $0x8] sm:$0xff] %vm980_vm1, %v979_v50 }
 0x17b   : > { %1627 = shalt.err (!%p1624_p9)
}
 0x17c   : > { %s1694_s30 = smov 128   ;;  %s1695_s8 = smov 8  }
 0x17d   : > { %1428 = dma.vmem_to_hbm [thread:$0]  (%p1776_p4), %s999_s28, 256, %s1001_s9, %s984_s27, %s1694_s30, %s1694_s30, %s1695_s8  }
 0x17e PF: > { %p1450_p10 = scmp.ge.s32.totalorder %s1686_s29, 2  ;;  %s1015_s10 = sand.u32 1, %s1666_s24  }
 0x17f   : > { %s1016_s12 = scalar_lea.sflag [#allocation6], %s1015_s10 }
 0x180   : > { %p1441_p11 = pnand %p1450_p10, %p1783_p8 }
 0x182   : > { %p1442_p12 = pneg %p1441_p11 }
 0x184   : > { %1661 = dma.done.wait (%p1442_p12), %s1016_s12, 256  }
 0x185   : > { %1663 = vsyncadd (%p1442_p12), %s1016_s12, 4294967040  ;;  %s22_s29 = sadd.s32 1, %s1686_s29   ;;  %s1909_s17 = sld [smem:[#allocation16_spill]] }
 0x186   : > { %p19_p13 = scmp.ge.s32.totalorder %s22_s29, 4   ;;  %s1910_s27 = sld [smem:[#allocation14_spill]] }
 0x187   : > { %s1911_s28 = sld [smem:[#allocation15_spill]]  ;;  %s1912_s24 = smov %s1670_s25 }
 0x188   : > { %s1913_s25 = smov %s1674_s26  ;;  %21 = sbr.rel (!%p19_p13) target bundleno = 8 (0x8), region = 104 }
 0x18b   : > { %s1914_s26 = smov %s1909_s17 }
 0x18d   :  { %1022 = vsyncpa [#allocation5], 1 }
 0x18e   :  { %1024 = vsyncpa [#allocation5 + $0x1], 1 }
 0x18f   :  { %1025 = vsyncpa [#allocation8], 1 }
 0x190   :  { %1026 = vsyncpa [#allocation6], 1 }
 0x191   :  { %1028 = vsyncpa [#allocation6 + $0x1], 1 }

</bundles_post_ra>
